<compile_context>
chip_gen: v5e
topology: v5e:2x2
jax: 0.10.0
libtpu: 0.0.40
codegen_flags: <defaults>
</compile_context>

<pallas_src>
import functools

import jax
import jax.numpy as jnp
from jax.experimental import pallas as pl
from jax.experimental.pallas import tpu as pltpu


# ------------------------------ fused kernel ------------------------------- #

def _model_kernel(theta_ref, xy_ref,
                  w1t_ref, w1xy_ref, b1_ref, w2_ref, b2_ref,
                  w3a_ref, w3xy_ref, b3_ref, w4_ref, b4_ref,
                  act_a_ref, rho_ref, *, n_real):
    BB, N, _ = xy_ref.shape          # N is the (possibly padded) block length
    H = w2_ref.shape[0]

    xy = xy_ref[...]                 # (BB, N, Dxy)  f32
    th = theta_ref[...]              # (BB, T)       f32

    # Tiny-K contributions on the VPU: concat(feat) @ W == sum_k feat[...,k]*W[k].
    # Avoids K=1..4 MXU pushes that pad K to the systolic tile.
    def mac2d(x, w):                 # x: (R, K), w: (K, H) -> (R, H)
        out = x[:, 0:1] * w[0].reshape(1, H)
        for k in range(1, w.shape[0]):
            out = out + x[:, k:k + 1] * w[k].reshape(1, H)
        return out

    def mac3d(x, w):                 # x: (BB, N, K), w: (K, H) -> (BB, N, H)
        out = x[:, :, 0:1] * w[0].reshape(1, 1, H)
        for k in range(1, w.shape[0]):
            out = out + x[:, :, k:k + 1] * w[k].reshape(1, 1, H)
        return out

    # ------------------------------ encoder --------------------------------
    th_h = mac2d(th, w1t_ref[...])                                   # (BB, H) per-batch
    h1 = mac3d(xy, w1xy_ref[...]) + th_h[:, None, :] + b1_ref[...]   # (BB, N, H)
    h1 = jnp.maximum(h1, 0.0)
    a = jnp.dot(h1.reshape(BB * N, H), w2_ref[...],
                preferred_element_type=jnp.float32)
    a = a.reshape(BB, N, H) + b2_ref[...]                            # f32
    act_a_ref[...] = a.astype(act_a_ref.dtype)                       # bf16 writeback

    # Deepset mean on-chip (no HBM round trip); mask padded points (static).
    if n_real != N:
        pt = jax.lax.broadcasted_iota(jnp.int32, (1, N, 1), 1)
        a = jnp.where(pt < n_real, a, 0.0)
    act = jnp.sum(a, axis=1) * (1.0 / n_real)                        # (BB, H)

    # ------------------------------ decoder --------------------------------
    act_h = jnp.dot(act, w3a_ref[...], preferred_element_type=jnp.float32)   # (BB, H)
    h2 = mac3d(xy, w3xy_ref[...]) + act_h[:, None, :] + b3_ref[...]
    h2 = jnp.maximum(h2, 0.0)
    # Scalar-per-point projection as a lane reduction against the w4 row
    # (avoids a (rows, 1) matmul output / masked stores).
    o = jnp.sum(h2 * w4_ref[...].reshape(1, 1, H), axis=-1) + b4_ref[0]      # (BB, N)
    rho_ref[...] = jax.nn.sigmoid(o).astype(rho_ref.dtype)


# -------------------------------- wrapper ----------------------------------- #

def _num_tensorcores():
    """2 on v7x (megacore), 1 on v5e/v6e; detection failure defaults to 1."""
    try:
        kind = (jax.devices()[0].device_kind or "").lower()
        if "v7" in kind:
            return 2
    except Exception:
        pass
    return 1


def _vmem_estimate(bb, n, h, t, dxy, act_bytes):
    rows = bb * n
    io = 2 * (rows * h * act_bytes        # act_a tile   (double-buffered)
              + rows * 4                  # rho tile
              + rows * dxy * 4            # xy tile
              + bb * t * 4)               # theta tile
    inter = 6 * rows * h * 4              # live f32 intermediates (h1/a/h2/...)
    return io + inter


def _pick_block_b(B, n, h, t, dxy, act_bytes, num_tc,
                  target_rows=2048, vmem_budget=24 * 2 ** 20):
    """Batch elements per grid step: ~target_rows rows per matmul, capped by a
    VMEM estimate; keep >= num_tc grid steps only on multi-TensorCore chips."""
    bb = max(1, min(B, max(1, target_rows // max(n, 1))))
    if num_tc > 1 and B >= num_tc:
        bb = min(bb, max(1, B // num_tc))
    while bb > 1 and _vmem_estimate(bb, n, h, t, dxy, act_bytes) > vmem_budget:
        bb -= 1
    while B % bb:
        bb -= 1
    return max(bb, 1)


def model_forward(params, batch_size, theta, xs, ys, *,
                  block_b=None, act_dtype=jnp.bfloat16):
    """Reproduces Model.forward: returns (activation_a, rho_hat)."""
    del batch_size  # shapes carry it
    B, N, Dx = xs.shape
    Dy = ys.shape[-1]
    T = theta.shape[-1]
    H = params["w2"].shape[0]
    Dxy = Dx + Dy

    # Host-side weight slicing (replaces the per-point feature concatenation).
    w1, w3 = params["w1"], params["w3"]
    w1t, w1xy = w1[:T], w1[T:]            # (T,H), (Dxy,H)
    w3a, w3xy = w3[:H], w3[H:]            # (H,H), (Dxy,H)
    w4row = params["w4"].reshape(1, H)    # (H,1) -> (1,H) row vector
    b4s = params["b4"].reshape(1)         # scalar bias -> SMEM

    # One lane-dense per-point input instead of two size-1-lane streams.
    xy = jnp.concatenate([xs, ys], axis=-1).astype(jnp.float32)     # (B, N, Dxy)
    theta2 = theta.astype(jnp.float32).reshape(B, T)

    # Pad N to a multiple of 8 so in-kernel reshapes are layout no-ops.
    n_pad = (-N) % 8
    Np = N + n_pad
    if n_pad:
        xy = jnp.pad(xy, ((0, 0), (0, n_pad), (0, 0)))

    num_tc = _num_tensorcores()
    act_bytes = jnp.dtype(act_dtype).itemsize
    if block_b is None:
        BB = _pick_block_b(B, Np, H, T, Dxy, act_bytes, num_tc)
    else:
        assert B % block_b == 0, "block_b must divide the batch size"
        BB = block_b
    est = _vmem_estimate(BB, Np, H, T, Dxy, act_bytes)
    vmem_limit = int(min(56 * 2 ** 20, max(32 * 2 ** 20, 2 * est)))

    kernel = functools.partial(_model_kernel, n_real=N)

    act_a, rho = pl.pallas_call(
        kernel,
        out_shape=(
            jax.ShapeDtypeStruct((B, Np, H), act_dtype),        # activation_a (bf16)
            jax.ShapeDtypeStruct((B, Np), jnp.float32),         # rho, 2D lane-dense
        ),
        grid_spec=pltpu.PrefetchScalarGridSpec(
            num_scalar_prefetch=0,
            grid=(B // BB,),
            in_specs=[
                pl.BlockSpec((BB, T), lambda b: (b, 0)),        # theta
                pl.BlockSpec((BB, Np, Dxy), lambda b: (b, 0, 0)),  # xy
                pl.BlockSpec((T, H), lambda b: (0, 0)),         # w1[:T]
                pl.BlockSpec((Dxy, H), lambda b: (0, 0)),       # w1[T:]
                pl.BlockSpec((1, H), lambda b: (0, 0)),         # b1
                pl.BlockSpec((H, H), lambda b: (0, 0)),         # w2
                pl.BlockSpec((1, H), lambda b: (0, 0)),         # b2
                pl.BlockSpec((H, H), lambda b: (0, 0)),         # w3[:H]
                pl.BlockSpec((Dxy, H), lambda b: (0, 0)),       # w3[H:]
                pl.BlockSpec((1, H), lambda b: (0, 0)),         # b3
                pl.BlockSpec((1, H), lambda b: (0, 0)),         # w4 row
                pl.BlockSpec(memory_space=pltpu.MemorySpace.SMEM),  # b4 scalar
            ],
            out_specs=[
                pl.BlockSpec((BB, Np, H), lambda b: (b, 0, 0)),
                pl.BlockSpec((BB, Np), lambda b: (b, 0)),
            ],
        ),
        compiler_params=pltpu.CompilerParams(
            dimension_semantics=("parallel",),
            vmem_limit_bytes=vmem_limit,
        ),
    )(theta2, xy, w1t, w1xy, params["b1"], params["w2"], params["b2"],
      w3a, w3xy, params["b3"], w4row, b4s)

    if n_pad:
        act_a = act_a[:, :N]
        rho = rho[:, :N]
    rho_hat = rho.reshape(B, N, 1)        # free metadata reshape
    return act_a, rho_hat


# --------------------------- pure-JAX reference ----------------------------- #

def model_reference(params, theta, xs, ys):
    B, N, _ = xs.shape
    th_b = jnp.broadcast_to(theta[:, None, :], (B, N, theta.shape[-1]))
    f = jnp.concatenate([th_b, xs, ys], axis=-1)
    h1 = jax.nn.relu(f @ params["w1"] + params["b1"])
    a = h1 @ params["w2"] + params["b2"]
    act = jnp.mean(a, axis=1)
    act_b = jnp.broadcast_to(act[:, None, :], (B, N, act.shape[-1]))
    g = jnp.concatenate([act_b, xs, ys], axis=-1)
    h2 = jax.nn.relu(g @ params["w3"] + params["b3"])
    rho = jax.nn.sigmoid(h2 @ params["w4"] + params["b4"])
    return a, rho


def init_params(key, theta_dim, dx, dy, hidden):
    # hidden must be a multiple of 8; hidden=128 is the fully lane-dense size.
    k1, k2, k3, k4, k5, k6, k7, k8 = jax.random.split(key, 8)
    din = theta_dim + dx + dy
    dd = hidden + dx + dy
    scale = 0.1
    return {
        "w1": scale * jax.random.normal(k1, (din, hidden), jnp.float32),
        "b1": scale * jax.random.normal(k5, (1, hidden), jnp.float32),
        "w2": scale * jax.random.normal(k2, (hidden, hidden), jnp.float32),
        "b2": scale * jax.random.normal(k6, (1, hidden), jnp.float32),
        "w3": scale * jax.random.normal(k3, (dd, hidden), jnp.float32),
        "b3": scale * jax.random.normal(k7, (1, hidden), jnp.float32),
        "w4": scale * jax.random.normal(k4, (hidden, 1), jnp.float32),
        "b4": scale * jax.random.normal(k8, (1, 1), jnp.float32),
    }


if __name__ == "__main__":
    B, N, T, DX, DY, H = 2, 8, 4, 1, 1, 32
    key = jax.random.PRNGKey(0)
    kp, kt, kx, ky = jax.random.split(key, 4)

    params = init_params(kp, T, DX, DY, H)
    theta = jax.random.normal(kt, (B, T), jnp.float32)
    xs = jax.random.normal(kx, (B, N, DX), jnp.float32)
    ys = jax.random.normal(ky, (B, N, DY), jnp.float32)

    activation_a, rho_hat = jax.jit(
        lambda p, th, x, y: model_forward(p, B, th, x, y))(params, theta, xs, ys)
    jax.block_until_ready((activation_a, rho_hat))

    assert activation_a.shape == (B, N, H)
    assert rho_hat.shape == (B, N, 1)
    assert bool(jnp.all(jnp.isfinite(activation_a.astype(jnp.float32))))
    assert bool(jnp.all((rho_hat >= 0.0) & (rho_hat <= 1.0)))

    # numerical check against the pure-JAX reference (concat formulation)
    ref_a, ref_rho = model_reference(params, theta, xs, ys)
    # act_a is stored in bf16 (perf feedback) -> compare at bf16 tolerance.
    assert bool(jnp.allclose(activation_a.astype(jnp.float32), ref_a,
                             atol=2e-2, rtol=2e-2))
    # rho is computed entirely from f32 intermediates.
    assert bool(jnp.allclose(rho_hat, ref_rho, atol=1e-3, rtol=1e-3))

    print("KERNEL_OK")
</pallas_src>

<mosaic_0001>
module attributes {stable_mosaic.version = 11 : i64} {
  func.func @_model_kernel(%arg0: i32, %arg1: memref<2x4xf32, #tpu.memory_space<vmem>>, %arg2: memref<2x8x2xf32, #tpu.memory_space<vmem>>, %arg3: memref<4x32xf32, #tpu.memory_space<vmem>>, %arg4: memref<2x32xf32, #tpu.memory_space<vmem>>, %arg5: memref<1x32xf32, #tpu.memory_space<vmem>>, %arg6: memref<32x32xf32, #tpu.memory_space<vmem>>, %arg7: memref<1x32xf32, #tpu.memory_space<vmem>>, %arg8: memref<32x32xf32, #tpu.memory_space<vmem>>, %arg9: memref<2x32xf32, #tpu.memory_space<vmem>>, %arg10: memref<1x32xf32, #tpu.memory_space<vmem>>, %arg11: memref<1x32xf32, #tpu.memory_space<vmem>>, %arg12: memref<1xf32, #tpu.memory_space<smem>>, %arg13: memref<2x8x32xbf16, #tpu.memory_space<vmem>>, %arg14: memref<2x8xf32, #tpu.memory_space<vmem>>) attributes {dimension_semantics = [#tpu.dimension_semantics<parallel>], iteration_bounds = array<i64: 1>, scalar_prefetch = 0 : i64, scratch_operands = 0 : i64, tpu.core_type = #tpu.core_type<tc>, window_params = [{transform_indices = @transform_0, window_bounds = array<i64: 2, 4>}, {transform_indices = @transform_1, window_bounds = array<i64: 2, 8, 2>}, {pipeline_mode = #tpu.pipeline_mode<synchronous>, transform_indices = @transform_2, window_bounds = array<i64: 4, 32>}, {pipeline_mode = #tpu.pipeline_mode<synchronous>, transform_indices = @transform_3, window_bounds = array<i64: 2, 32>}, {pipeline_mode = #tpu.pipeline_mode<synchronous>, transform_indices = @transform_4, window_bounds = array<i64: 1, 32>}, {pipeline_mode = #tpu.pipeline_mode<synchronous>, transform_indices = @transform_5, window_bounds = array<i64: 32, 32>}, {pipeline_mode = #tpu.pipeline_mode<synchronous>, transform_indices = @transform_6, window_bounds = array<i64: 1, 32>}, {pipeline_mode = #tpu.pipeline_mode<synchronous>, transform_indices = @transform_7, window_bounds = array<i64: 32, 32>}, {pipeline_mode = #tpu.pipeline_mode<synchronous>, transform_indices = @transform_8, window_bounds = array<i64: 2, 32>}, {pipeline_mode = #tpu.pipeline_mode<synchronous>, transform_indices = @transform_9, window_bounds = array<i64: 1, 32>}, {pipeline_mode = #tpu.pipeline_mode<synchronous>, transform_indices = @transform_10, window_bounds = array<i64: 1, 32>}, {transform_indices = @transform_11, window_bounds = array<i64: 1>}, {transform_indices = @transform_12, window_bounds = array<i64: 2, 8, 32>}, {transform_indices = @transform_13, window_bounds = array<i64: 2, 8>}]} {
    %c0 = arith.constant 0 : index
    %c0_0 = arith.constant 0 : index
    %c0_1 = arith.constant 0 : index
    %0 = vector.load %arg2[%c0, %c0_0, %c0_1] : memref<2x8x2xf32, #tpu.memory_space<vmem>>, vector<2x8x2xf32>
    %c0_2 = arith.constant 0 : index
    %c0_3 = arith.constant 0 : index
    %1 = vector.load %arg1[%c0_2, %c0_3] : memref<2x4xf32, #tpu.memory_space<vmem>>, vector<2x4xf32>
    %c0_4 = arith.constant 0 : index
    %c0_5 = arith.constant 0 : index
    %2 = vector.load %arg3[%c0_4, %c0_5] : memref<4x32xf32, #tpu.memory_space<vmem>>, vector<4x32xf32>
    %3 = vector.extract_strided_slice %1 {offsets = [0, 0], sizes = [2, 1], strides = [1, 1]} : vector<2x4xf32> to vector<2x1xf32>
    %4 = vector.extract_strided_slice %2 {offsets = [0, 0], sizes = [1, 32], strides = [1, 1]} : vector<4x32xf32> to vector<1x32xf32>
    %5 = vector.shape_cast %4 : vector<1x32xf32> to vector<32xf32>
    %6 = vector.shape_cast %5 : vector<32xf32> to vector<1x32xf32>
    %7 = vector.broadcast %3 : vector<2x1xf32> to vector<2x32xf32>
    %8 = vector.broadcast %6 : vector<1x32xf32> to vector<2x32xf32>
    %9 = arith.mulf %7, %8 : vector<2x32xf32>
    %10 = vector.extract_strided_slice %1 {offsets = [0, 1], sizes = [2, 1], strides = [1, 1]} : vector<2x4xf32> to vector<2x1xf32>
    %11 = vector.extract_strided_slice %2 {offsets = [1, 0], sizes = [1, 32], strides = [1, 1]} : vector<4x32xf32> to vector<1x32xf32>
    %12 = vector.shape_cast %11 : vector<1x32xf32> to vector<32xf32>
    %13 = vector.shape_cast %12 : vector<32xf32> to vector<1x32xf32>
    %14 = vector.broadcast %10 : vector<2x1xf32> to vector<2x32xf32>
    %15 = vector.broadcast %13 : vector<1x32xf32> to vector<2x32xf32>
    %16 = arith.mulf %14, %15 : vector<2x32xf32>
    %17 = arith.addf %9, %16 : vector<2x32xf32>
    %18 = vector.extract_strided_slice %1 {offsets = [0, 2], sizes = [2, 1], strides = [1, 1]} : vector<2x4xf32> to vector<2x1xf32>
    %19 = vector.extract_strided_slice %2 {offsets = [2, 0], sizes = [1, 32], strides = [1, 1]} : vector<4x32xf32> to vector<1x32xf32>
    %20 = vector.shape_cast %19 : vector<1x32xf32> to vector<32xf32>
    %21 = vector.shape_cast %20 : vector<32xf32> to vector<1x32xf32>
    %22 = vector.broadcast %18 : vector<2x1xf32> to vector<2x32xf32>
    %23 = vector.broadcast %21 : vector<1x32xf32> to vector<2x32xf32>
    %24 = arith.mulf %22, %23 : vector<2x32xf32>
    %25 = arith.addf %17, %24 : vector<2x32xf32>
    %26 = vector.extract_strided_slice %1 {offsets = [0, 3], sizes = [2, 1], strides = [1, 1]} : vector<2x4xf32> to vector<2x1xf32>
    %27 = vector.extract_strided_slice %2 {offsets = [3, 0], sizes = [1, 32], strides = [1, 1]} : vector<4x32xf32> to vector<1x32xf32>
    %28 = vector.shape_cast %27 : vector<1x32xf32> to vector<32xf32>
    %29 = vector.shape_cast %28 : vector<32xf32> to vector<1x32xf32>
    %30 = vector.broadcast %26 : vector<2x1xf32> to vector<2x32xf32>
    %31 = vector.broadcast %29 : vector<1x32xf32> to vector<2x32xf32>
    %32 = arith.mulf %30, %31 : vector<2x32xf32>
    %33 = arith.addf %25, %32 : vector<2x32xf32>
    %c0_6 = arith.constant 0 : index
    %c0_7 = arith.constant 0 : index
    %34 = vector.load %arg4[%c0_6, %c0_7] : memref<2x32xf32, #tpu.memory_space<vmem>>, vector<2x32xf32>
    %35 = vector.extract_strided_slice %0 {offsets = [0, 0, 0], sizes = [2, 8, 1], strides = [1, 1, 1]} : vector<2x8x2xf32> to vector<2x8x1xf32>
    %36 = vector.extract_strided_slice %34 {offsets = [0, 0], sizes = [1, 32], strides = [1, 1]} : vector<2x32xf32> to vector<1x32xf32>
    %37 = vector.shape_cast %36 : vector<1x32xf32> to vector<32xf32>
    %38 = vector.shape_cast %37 : vector<32xf32> to vector<1x1x32xf32>
    %39 = vector.broadcast %35 : vector<2x8x1xf32> to vector<2x8x32xf32>
    %40 = vector.broadcast %38 : vector<1x1x32xf32> to vector<2x8x32xf32>
    %41 = arith.mulf %39, %40 : vector<2x8x32xf32>
    %42 = vector.extract_strided_slice %0 {offsets = [0, 0, 1], sizes = [2, 8, 1], strides = [1, 1, 1]} : vector<2x8x2xf32> to vector<2x8x1xf32>
    %43 = vector.extract_strided_slice %34 {offsets = [1, 0], sizes = [1, 32], strides = [1, 1]} : vector<2x32xf32> to vector<1x32xf32>
    %44 = vector.shape_cast %43 : vector<1x32xf32> to vector<32xf32>
    %45 = vector.shape_cast %44 : vector<32xf32> to vector<1x1x32xf32>
    %46 = vector.broadcast %42 : vector<2x8x1xf32> to vector<2x8x32xf32>
    %47 = vector.broadcast %45 : vector<1x1x32xf32> to vector<2x8x32xf32>
    %48 = arith.mulf %46, %47 : vector<2x8x32xf32>
    %49 = arith.addf %41, %48 : vector<2x8x32xf32>
    %50 = vector.shape_cast %33 : vector<2x32xf32> to vector<2x1x32xf32>
    %51 = vector.broadcast %50 : vector<2x1x32xf32> to vector<2x8x32xf32>
    %52 = arith.addf %49, %51 : vector<2x8x32xf32>
    %c0_8 = arith.constant 0 : index
    %c0_9 = arith.constant 0 : index
    %53 = vector.load %arg5[%c0_8, %c0_9] : memref<1x32xf32, #tpu.memory_space<vmem>>, vector<1x32xf32>
    %54 = vector.shape_cast %53 : vector<1x32xf32> to vector<1x1x32xf32>
    %55 = vector.broadcast %54 : vector<1x1x32xf32> to vector<2x8x32xf32>
    %56 = arith.addf %52, %55 : vector<2x8x32xf32>
    %cst = arith.constant 0.000000e+00 : f32
    %57 = vector.broadcast %cst : f32 to vector<2x8x32xf32>
    %58 = arith.maximumf %56, %57 : vector<2x8x32xf32>
    %59 = vector.shape_cast %58 : vector<2x8x32xf32> to vector<16x32xf32>
    %c0_10 = arith.constant 0 : index
    %c0_11 = arith.constant 0 : index
    %60 = vector.load %arg6[%c0_10, %c0_11] : memref<32x32xf32, #tpu.memory_space<vmem>>, vector<32x32xf32>
    %cst_12 = arith.constant dense<0.000000e+00> : vector<16x32xf32>
    %61 = tpu.matmul %59, %60, %cst_12 {dimension_numbers = #tpu.dot_dimension_numbers<[1], [0], [0], [1], [0, 0, 1, 1], [], []>} : vector<16x32xf32>, vector<32x32xf32>, vector<16x32xf32> -> vector<16x32xf32>
    %62 = vector.shape_cast %61 : vector<16x32xf32> to vector<2x8x32xf32>
    %c0_13 = arith.constant 0 : index
    %c0_14 = arith.constant 0 : index
    %63 = vector.load %arg7[%c0_13, %c0_14] : memref<1x32xf32, #tpu.memory_space<vmem>>, vector<1x32xf32>
    %64 = vector.shape_cast %63 : vector<1x32xf32> to vector<1x1x32xf32>
    %65 = vector.broadcast %64 : vector<1x1x32xf32> to vector<2x8x32xf32>
    %66 = arith.addf %62, %65 : vector<2x8x32xf32>
    %67 = arith.truncf %66 : vector<2x8x32xf32> to vector<2x8x32xbf16>
    %c0_15 = arith.constant 0 : index
    %c0_16 = arith.constant 0 : index
    %c0_17 = arith.constant 0 : index
    %68 = vector.load %arg13[%c0_15, %c0_16, %c0_17] : memref<2x8x32xbf16, #tpu.memory_space<vmem>>, vector<2x8x32xbf16>
    tpu.vector_store %arg13[%c0_15, %c0_16, %c0_17], %67 {strides = array<i32>} : memref<2x8x32xbf16, #tpu.memory_space<vmem>>, vector<2x8x32xbf16>,
    %cst_18 = arith.constant dense<0.000000e+00> : vector<2x32xf32>
    %69 = vector.multi_reduction <add>, %66, %cst_18 [1] : vector<2x8x32xf32> to vector<2x32xf32>
    %cst_19 = arith.constant 1.250000e-01 : f32
    %70 = vector.broadcast %cst_19 : f32 to vector<2x32xf32>
    %71 = arith.mulf %69, %70 : vector<2x32xf32>
    %c0_20 = arith.constant 0 : index
    %c0_21 = arith.constant 0 : index
    %72 = vector.load %arg8[%c0_20, %c0_21] : memref<32x32xf32, #tpu.memory_space<vmem>>, vector<32x32xf32>
    %cst_22 = arith.constant dense<0.000000e+00> : vector<2x32xf32>
    %73 = tpu.matmul %71, %72, %cst_22 {dimension_numbers = #tpu.dot_dimension_numbers<[1], [0], [0], [1], [0, 0, 1, 1], [], []>} : vector<2x32xf32>, vector<32x32xf32>, vector<2x32xf32> -> vector<2x32xf32>
    %c0_23 = arith.constant 0 : index
    %c0_24 = arith.constant 0 : index
    %74 = vector.load %arg9[%c0_23, %c0_24] : memref<2x32xf32, #tpu.memory_space<vmem>>, vector<2x32xf32>
    %75 = vector.extract_strided_slice %0 {offsets = [0, 0, 0], sizes = [2, 8, 1], strides = [1, 1, 1]} : vector<2x8x2xf32> to vector<2x8x1xf32>
    %76 = vector.extract_strided_slice %74 {offsets = [0, 0], sizes = [1, 32], strides = [1, 1]} : vector<2x32xf32> to vector<1x32xf32>
    %77 = vector.shape_cast %76 : vector<1x32xf32> to vector<32xf32>
    %78 = vector.shape_cast %77 : vector<32xf32> to vector<1x1x32xf32>
    %79 = vector.broadcast %75 : vector<2x8x1xf32> to vector<2x8x32xf32>
    %80 = vector.broadcast %78 : vector<1x1x32xf32> to vector<2x8x32xf32>
    %81 = arith.mulf %79, %80 : vector<2x8x32xf32>
    %82 = vector.extract_strided_slice %0 {offsets = [0, 0, 1], sizes = [2, 8, 1], strides = [1, 1, 1]} : vector<2x8x2xf32> to vector<2x8x1xf32>
    %83 = vector.extract_strided_slice %74 {offsets = [1, 0], sizes = [1, 32], strides = [1, 1]} : vector<2x32xf32> to vector<1x32xf32>
    %84 = vector.shape_cast %83 : vector<1x32xf32> to vector<32xf32>
    %85 = vector.shape_cast %84 : vector<32xf32> to vector<1x1x32xf32>
    %86 = vector.broadcast %82 : vector<2x8x1xf32> to vector<2x8x32xf32>
    %87 = vector.broadcast %85 : vector<1x1x32xf32> to vector<2x8x32xf32>
    %88 = arith.mulf %86, %87 : vector<2x8x32xf32>
    %89 = arith.addf %81, %88 : vector<2x8x32xf32>
    %90 = vector.shape_cast %73 : vector<2x32xf32> to vector<2x1x32xf32>
    %91 = vector.broadcast %90 : vector<2x1x32xf32> to vector<2x8x32xf32>
    %92 = arith.addf %89, %91 : vector<2x8x32xf32>
    %c0_25 = arith.constant 0 : index
    %c0_26 = arith.constant 0 : index
    %93 = vector.load %arg10[%c0_25, %c0_26] : memref<1x32xf32, #tpu.memory_space<vmem>>, vector<1x32xf32>
    %94 = vector.shape_cast %93 : vector<1x32xf32> to vector<1x1x32xf32>
    %95 = vector.broadcast %94 : vector<1x1x32xf32> to vector<2x8x32xf32>
    %96 = arith.addf %92, %95 : vector<2x8x32xf32>
    %cst_27 = arith.constant 0.000000e+00 : f32
    %97 = vector.broadcast %cst_27 : f32 to vector<2x8x32xf32>
    %98 = arith.maximumf %96, %97 : vector<2x8x32xf32>
    %c0_28 = arith.constant 0 : index
    %c0_29 = arith.constant 0 : index
    %99 = vector.load %arg11[%c0_28, %c0_29] : memref<1x32xf32, #tpu.memory_space<vmem>>, vector<1x32xf32>
    %100 = vector.shape_cast %99 : vector<1x32xf32> to vector<1x1x32xf32>
    %101 = vector.broadcast %100 : vector<1x1x32xf32> to vector<2x8x32xf32>
    %102 = arith.mulf %98, %101 : vector<2x8x32xf32>
    %cst_30 = arith.constant dense<0.000000e+00> : vector<2x8xf32>
    %103 = vector.multi_reduction <add>, %102, %cst_30 [2] : vector<2x8x32xf32> to vector<2x8xf32>
    %c0_31 = arith.constant 0 : index
    %104 = memref.load %arg12[%c0_31] : memref<1xf32, #tpu.memory_space<smem>>
    %105 = vector.broadcast %104 : f32 to vector<2x8xf32>
    %106 = arith.addf %103, %105 : vector<2x8xf32>
    %107 = arith.negf %106 : vector<2x8xf32>
    %108 = math.exp %107 : vector<2x8xf32>
    %cst_32 = arith.constant 1.000000e+00 : f32
    %109 = vector.broadcast %cst_32 : f32 to vector<2x8xf32>
    %110 = arith.addf %109, %108 : vector<2x8xf32>
    %111 = arith.divf %109, %110 : vector<2x8xf32>
    %c0_33 = arith.constant 0 : index
    %c0_34 = arith.constant 0 : index
    %112 = vector.load %arg14[%c0_33, %c0_34] : memref<2x8xf32, #tpu.memory_space<vmem>>, vector<2x8xf32>
    tpu.vector_store %arg14[%c0_33, %c0_34], %111 {strides = array<i32>} : memref<2x8xf32, #tpu.memory_space<vmem>>, vector<2x8xf32>,
    return
  }
  func.func @transform_0(%arg0: i32) -> (i32, i32) {
    %c0_i32 = arith.constant 0 : i32
    %c0_i32_0 = arith.constant 0 : i32
    return %arg0, %c0_i32 : i32, i32
  }
  func.func @transform_1(%arg0: i32) -> (i32, i32, i32) {
    %c0_i32 = arith.constant 0 : i32
    %c0_i32_0 = arith.constant 0 : i32
    %c0_i32_1 = arith.constant 0 : i32
    return %arg0, %c0_i32, %c0_i32_0 : i32, i32, i32
  }
  func.func @transform_2(%arg0: i32) -> (i32, i32) {
    %c0_i32 = arith.constant 0 : i32
    %c0_i32_0 = arith.constant 0 : i32
    %c0_i32_1 = arith.constant 0 : i32
    return %c0_i32, %c0_i32_0 : i32, i32
  }
  func.func @transform_3(%arg0: i32) -> (i32, i32) {
    %c0_i32 = arith.constant 0 : i32
    %c0_i32_0 = arith.constant 0 : i32
    %c0_i32_1 = arith.constant 0 : i32
    return %c0_i32, %c0_i32_0 : i32, i32
  }
  func.func @transform_4(%arg0: i32) -> (i32, i32) {
    %c0_i32 = arith.constant 0 : i32
    %c0_i32_0 = arith.constant 0 : i32
    %c0_i32_1 = arith.constant 0 : i32
    return %c0_i32, %c0_i32_0 : i32, i32
  }
  func.func @transform_5(%arg0: i32) -> (i32, i32) {
    %c0_i32 = arith.constant 0 : i32
    %c0_i32_0 = arith.constant 0 : i32
    %c0_i32_1 = arith.constant 0 : i32
    return %c0_i32, %c0_i32_0 : i32, i32
  }
  func.func @transform_6(%arg0: i32) -> (i32, i32) {
    %c0_i32 = arith.constant 0 : i32
    %c0_i32_0 = arith.constant 0 : i32
    %c0_i32_1 = arith.constant 0 : i32
    return %c0_i32, %c0_i32_0 : i32, i32
  }
  func.func @transform_7(%arg0: i32) -> (i32, i32) {
    %c0_i32 = arith.constant 0 : i32
    %c0_i32_0 = arith.constant 0 : i32
    %c0_i32_1 = arith.constant 0 : i32
    return %c0_i32, %c0_i32_0 : i32, i32
  }
  func.func @transform_8(%arg0: i32) -> (i32, i32) {
    %c0_i32 = arith.constant 0 : i32
    %c0_i32_0 = arith.constant 0 : i32
    %c0_i32_1 = arith.constant 0 : i32
    return %c0_i32, %c0_i32_0 : i32, i32
  }
  func.func @transform_9(%arg0: i32) -> (i32, i32) {
    %c0_i32 = arith.constant 0 : i32
    %c0_i32_0 = arith.constant 0 : i32
    %c0_i32_1 = arith.constant 0 : i32
    return %c0_i32, %c0_i32_0 : i32, i32
  }
  func.func @transform_10(%arg0: i32) -> (i32, i32) {
    %c0_i32 = arith.constant 0 : i32
    %c0_i32_0 = arith.constant 0 : i32
    %c0_i32_1 = arith.constant 0 : i32
    return %c0_i32, %c0_i32_0 : i32, i32
  }
  func.func @transform_11(%arg0: i32) -> i32 {
    %c0_i32 = arith.constant 0 : i32
    %c0_i32_0 = arith.constant 0 : i32
    return %c0_i32 : i32
  }
  func.func @transform_12(%arg0: i32) -> (i32, i32, i32) {
    %c0_i32 = arith.constant 0 : i32
    %c0_i32_0 = arith.constant 0 : i32
    %c0_i32_1 = arith.constant 0 : i32
    return %arg0, %c0_i32, %c0_i32_0 : i32, i32, i32
  }
  func.func @transform_13(%arg0: i32) -> (i32, i32) {
    %c0_i32 = arith.constant 0 : i32
    %c0_i32_0 = arith.constant 0 : i32
    return %arg0, %c0_i32 : i32, i32
  }
}

</mosaic_0001>

<bundles_post_ra>
// kernel: _lambda_.1
= control target key start
LH: loop header
LB: loop body
LE: loop exit
PB: predicated region body
PF: predicated region fallthrough
CT: control target
= control target key end

     0   :  { %20 = vsyncpa [#allocation4], 0  ;;  %v423_v1 = vmov 2   ;;  %v424_v2 = vmov 0   ;;  %s588_s0 = inlined_call_operand.vmem [shape: f32[2,4], index: 0, kind: input, shape index: {}]   ;;  %s589_s1 = inlined_call_operand.vmem [shape: f32[2,8,2], index: 1, kind: input, shape index: {}]   ;;  %s590_s2 = inlined_call_operand.vmem [shape: f32[4,32], index: 2, kind: input, shape index: {}]   ;;  %s591_s3 = inlined_call_operand.vmem [shape: f32[2,32], index: 3, kind: input, shape index: {}]   ;;  %s592_s4 = inlined_call_operand.vmem [shape: f32[1,32], index: 4, kind: input, shape index: {}]   ;;  %s593_s5 = inlined_call_operand.vmem [shape: f32[32,32], index: 5, kind: input, shape index: {}]   ;;  %s594_s6 = inlined_call_operand.vmem [shape: f32[1,32], index: 6, kind: input, shape index: {}]   ;;  %s595_s7 = inlined_call_operand.vmem [shape: f32[32,32], index: 7, kind: input, shape index: {}]   ;;  %s596_s8 = inlined_call_operand.vmem [shape: f32[2,32], index: 8, kind: input, shape index: {}]   ;;  %s597_s9 = inlined_call_operand.vmem [shape: f32[1,32], index: 9, kind: input, shape index: {}]   ;;  %s598_s10 = inlined_call_operand.vmem [shape: f32[1,32], index: 10, kind: input, shape index: {}]   ;;  %s599_s11 = inlined_call_operand.<no memory space> [shape: f32[1], index: 11, kind: input, shape index: {}]   ;;  %s600_s12 = inlined_call_operand.hbm [shape: bf16[2,8,32], index: 12, kind: output, shape index: {0}]   ;;  %s601_s13 = inlined_call_operand.hbm [shape: f32[2,8], index: 13, kind: output, shape index: {1}]  }
   0x1   :  { %v48_v0 = vld [vmem:[%s588_s0] sm:$0x3]  ;;  %354 = vset.pattern.permute.xlu1 %v423_v1  ;;  %352 = vset.pattern.permute.xlu0 %v424_v2  ;;  %v47_v3 = vld [vmem:[%s589_s1 + $0x8] sm:$0xff] }
   0x2   :  { %65 = vperm.xlu1 %354, %v48_v0   ;;  %52 = vperm.xlu0 %352, %v48_v0  }
   0x3   :  { %356 = vset.pattern.permute.xlu2 %v424_v2 }
   0x4   :  { %86 = vperm.xlu2 %356, %v47_v3  }
   0x5   :  { %21 = vsyncpa [#allocation6], 0  ;;  %v425_v4 = vmov 3   ;;  %v426_v5 = vmov 1   ;;  %v46_v6 = vld [vmem:[%s589_s1] sm:$0xff]  ;;  %v124_v14 = vld [vmem:[%s593_s5 + $0x18] sm:$0xff] }
   0x6   :  { %v513_v8 = vld [vmem:[%s596_s8] sm:$0x3]  ;;  %340 = vmatpush.msra.mxu2 %v124_v14  ;;  %144 = vmatpush.msra.mxu0 %v124_v14  ;;  %v123_v16 = vld [vmem:[%s593_s5 + $0x10] sm:$0xff]  ;;  %v122_v17 = vld [vmem:[%s593_s5 + $0x8] sm:$0xff]  ;;  %vm125_vm0 = vcmask 261120   ;;  %vm163_vm1 = vcmask 257024  }
   0x7   :  { %v213_v9 = vperm.slane %v513_v8, 0  ;;  %v216_v10 = vperm.slane %v513_v8, 1  ;;  %v121_v18 = vld [vmem:[%s593_s5] sm:$0xff]  ;;  %v185_v56 = vld [vmem:[%s595_s7 + $0x18] sm:$0xff]  ;;  %v184_v57 = vld [vmem:[%s595_s7 + $0x10] sm:$0xff]  ;;  %vm188_vm2 = vcmask 1041409  }
   0x8   :  { %341 = vmatpush.msra.mxu2 %v123_v16  ;;  %145 = vmatpush.msra.mxu0 %v123_v16  ;;  %v49_v21 = vld [vmem:[%s590_s2] sm:$0xf]  ;;  %v183_v58 = vld [vmem:[%s595_s7 + $0x8] sm:$0xff]  ;;  %s307_s16 = sshll.u32 %s600_s12, 4  ;;  %s427_s17 = smov [#allocation3]   ;;  %vm299_vm11 = vcmask 58368   ;;  %s308_s16 = int_to_ptr.hbm [resolvable:$true] %s307_s16 }
   0x9   :  { %v55_v22 = vperm.slane %v49_v21, 0  ;;  %v61_v23 = vperm.slane %v49_v21, 1  ;;  %v78_v24 = vld [vmem:[%s591_s3] sm:$0x3]  ;;  %v68_v25 = vperm.slane %v49_v21, 2  ;;  %v75_v26 = vperm.slane %v49_v21, 3  ;;  %204 = vmatpush.msra.mxu1 %v185_v56 }
   0xa   :  { %355 = vset.pattern.permute.xlu1 %v425_v4  ;;  %353 = vset.pattern.permute.xlu0 %v426_v5  ;;  %v89_v31 = vperm.slane %v78_v24, 0  ;;  %v100_v33 = vperm.slane %v78_v24, 1  ;;  %v359_v47 = vld [vmem:[%s592_s4] ss:$0 sm:$0xff]  ;;  %s305_s18 = sshll.u32 %s427_s17, 4  ;;  %s429_s19 = smov 4   ;;  %v293_v56 = vlaneseq  ;;  %s306_s18 = int_to_ptr.vmem [resolvable:$true] %s305_s18 }
   0xb   :  { %72 = vperm.xlu1 %355, %v48_v0   ;;  %58 = vperm.xlu0 %353, %v48_v0   ;;  %v182_v59 = vld [vmem:[%s595_s7] sm:$0xff]  ;;  %s321_s24 = sshll.u32 %s601_s13, 4  ;;  %s322_s24 = int_to_ptr.hbm [resolvable:$true] %s321_s24 }
   0xc   :  { %357 = vset.pattern.permute.xlu2 %v426_v5  ;;  %342 = vmatpush.msra.mxu2 %v122_v17  ;;  %v360_v60 = vld [vmem:[%s594_s6] ss:$0 sm:$0xff] }
   0xd   :  { %97 = vperm.xlu2 %357, %v47_v3   ;;  %146 = vmatpush.msra.mxu0 %v122_v17 }
   0xe   :  { %343 = vmatpush.msra.mxu2 %v121_v18  ;;  %205 = vmatpush.msra.mxu1 %v184_v57 }
   0xf   :  { %147 = vmatpush.msra.mxu0 %v121_v18 }
  0x10   :  { %206 = vmatpush.msra.mxu1 %v183_v58 }
  0x12   :  { %207 = vmatpush.msra.mxu1 %v182_v59 }
  0x13   :  { %358 = vset.pattern.permute.xlu1 %v424_v2 }
  0x14   :  { %81 = vperm.xlu1 %358, %v46_v6  }
  0x15   :  { %93 = vperm.xlu2 %357, %v46_v6  }
  0x5e   :  { %v87_v7 = vpop.permute.xlu2 %86 }
  0x5f   :  { %v215_v11 = vmul.f32 %v213_v9, %v87_v7  ;;  %v91_v37 = vmul.f32 %v89_v31, %v87_v7 }
  0x67   :  { %v98_v12 = vpop.permute.xlu2 %97 }
  0x68   :  { %v218_v13 = vmul.f32 %v216_v10, %v98_v12  ;;  %v102_v38 = vmul.f32 %v100_v33, %v98_v12 }
  0x6a   :  { %v524_v15 = vadd.f32 %v218_v13, %v215_v11  ;;  %v104_v45 = vadd.f32 %v102_v38, %v91_v37 }
  0x6f   :  { %v94_v40 = vpop.permute.xlu2 %93 }
  0x70   :  { %v101_v43 = vmul.f32 %v100_v33, %v94_v40 }
  0x74   :  { %v53_v19 = vpop.permute.xlu0 %52  ;;  %v66_v20 = vpop.permute.xlu1 %65 }
  0x75   :  { %v56_v29 = vmul.f32 %v55_v22, %v53_v19  ;;  %v69_v32 = vmul.f32 %v68_v25, %v66_v20  ;;  %v217_v25 = vmul.f32 %v216_v10, %v94_v40 }
  0x7d   :  { %v59_v27 = vpop.permute.xlu0 %58  ;;  %v73_v28 = vpop.permute.xlu1 %72 }
  0x7e   :  { %v62_v30 = vmul.f32 %v61_v23, %v59_v27  ;;  %v76_v35 = vmul.f32 %v75_v26, %v73_v28 }
  0x80   :  { %v63_v34 = vadd.f32 %v62_v30, %v56_v29  ;;  %v361_v30 = vld [vmem:[%s597_s9] ss:$0 sm:$0xff] }
  0x82   :  { %v70_v36 = vadd.f32 %v69_v32, %v63_v34 }
  0x84   :  { %v77_v39 = vadd.f32 %v76_v35, %v70_v36 }
  0x86   :  { %v106_v41 = vrot.slane %v77_v39, 1  ;;  %v82_v42 = vpop.permute.xlu1 %81  ;;  %v107_v48 = vperm.slane %v77_v39, 0 }
  0x87   :  { %v90_v44 = vmul.f32 %v89_v31, %v82_v42  ;;  %v214_v24 = vmul.f32 %v213_v9, %v82_v42  ;;  %v362_v9 = vld [vmem:[%s598_s10] ss:$0 sm:$0xff]  ;;  %s428_s10 = smov 64  }
  0x88   :  { %v108_v46 = vperm.slane %v106_v41, 0 }
  0x89   :  { %v103_v49 = vadd.f32 %v101_v43, %v90_v44  ;;  %v219_v27 = vadd.f32 %v217_v25, %v214_v24 }
  0x8a   :  { %v112_v50 = vadd.f32 %v108_v46, %v104_v45 }
  0x8b   :  { %v111_v51 = vadd.f32 %v107_v48, %v103_v49 }
  0x8c   :  { %v118_v52 = vadd.f32 %v359_v47, %v112_v50 }
  0x8d   :  { %v117_v53 = vadd.f32 %v359_v47, %v111_v51 }
  0x8e   :  { %v120_v54 = vmax.f32 %v118_v52, 0.0 }
  0x8f   :  { %v119_v55 = vmax.f32 %v117_v53, 0.0 }
  0x90   :  { %336 = vmatmul.msk.f32.vlgmr.msra.gmra.mxu2 %vm125_vm0, %v120_v54 }
  0x91   :  { %335 = vmatmul.msk.f32.vlgmr.msra.gmra.mxu0 %vm125_vm0, %v119_v55 }
 0x10e   :  { %v149_v61 = vpop.f32.mrf.mxu0 }
 0x10f   :  { %v159_v62 = vadd.f32 %v360_v60, %v149_v61 }
 0x111   :  { %v161_v63 = vpack.c.bf16 %v159_v62, %v159_v62  ;;  %v166_v0 = vsel %vm125_vm0, %v159_v62, 0.0 }
 0x112   :  { %v167_v1 = vrot.slane %v166_v0, 4 }
 0x113   :  { %164 = vst.msk [vmem:[#allocation3] sm:$0xf] %vm163_vm1, %v161_v63  ;;  %v152_v2 = vpop.f32.mrf.mxu2 }
 0x114   :  { %v168_v3 = vadd.f32 %v167_v1, %v166_v0  ;;  %v160_v4 = vadd.f32 %v360_v60, %v152_v2  ;;  %v294_v1 = vand.u32 127, %v293_v56 }
 0x116   :  { %v169_v5 = vrot.slane %v168_v3, 2  ;;  %v162_v6 = vpack.c.bf16 %v160_v4, %v160_v4  ;;  %v173_v7 = vsel %vm125_vm0, %v160_v4, 0.0 }
 0x117   :  { %v174_v11 = vrot.slane %v173_v7, 4 }
 0x118   :  { %v170_v12 = vadd.f32 %v169_v5, %v168_v3  ;;  %165 = vst.msk [vmem:[#allocation3 + $0x4] sm:$0xf] %vm163_vm1, %v162_v6 }
 0x119   :  { %v175_v13 = vadd.f32 %v174_v11, %v173_v7  ;;  %313 = dma.vmem_to_hbm [thread:$0]  %s306_s18, 128, %s308_s16, [#allocation4], %s428_s10, %s428_s10, %s429_s19  }
 0x11a   :  { %v171_v14 = vrot.slane %v170_v12, 1 }
 0x11b   :  { %v176_v16 = vrot.slane %v175_v13, 2 }
 0x11c   :  { %v172_v19 = vadd.f32 %v171_v14, %v170_v12 }
 0x11d   :  { %v177_v17 = vadd.f32 %v176_v16, %v175_v13 }
 0x11e   :  { %v180_v21 = vmul.f32 0.125, %v172_v19 }
 0x11f   :  { %v178_v18 = vrot.slane %v177_v17, 1 }
 0x121   :  { %v179_v20 = vadd.f32 %v178_v18, %v177_v17 }
 0x123   :  { %v181_v22 = vmul.f32 0.125, %v179_v20 }
 0x125   :  { %v189_v23 = vsel %vm188_vm2, %v181_v22, %v180_v21 }
 0x126   :  { %337 = vmatmul.msk.f32.vlgmr.msra.gmra.mxu1 %vm125_vm0, %v189_v23 }
 0x1a3   :  { %v209_v26 = vpop.f32.mrf.mxu1 }
 0x1a4   :  { %v222_v28 = vrot.slane %v209_v26, 1  ;;  %v223_v29 = vperm.slane %v209_v26, 0 }
 0x1a6   :  { %v224_v31 = vperm.slane %v222_v28, 0  ;;  %v227_v32 = vadd.f32 %v223_v29, %v219_v27 }
 0x1a8   :  { %v228_v33 = vadd.f32 %v224_v31, %v524_v15  ;;  %v233_v34 = vadd.f32 %v361_v30, %v227_v32  ;;  %v250_v15 = vstv %s599_s11  ;;  %s430_s11 = smov [#allocation5]  }
 0x1a9   :  { %s319_s12 = sshll.u32 %s430_s11, 4  ;;  %s320_s12 = int_to_ptr.vmem [resolvable:$true] %s319_s12 }
 0x1aa   :  { %v235_v35 = vmax.f32 %v233_v34, 0.0  ;;  %v234_v8 = vadd.f32 %v361_v30, %v228_v33 }
 0x1ac   :  { %v241_v10 = vmul.f32 %v362_v9, %v235_v35  ;;  %v236_v36 = vmax.f32 %v234_v8, 0.0 }
 0x1ae   :  { %v243_v37 = vsel %vm125_vm0, %v241_v10, 0.0  ;;  %v242_v38 = vmul.f32 %v362_v9, %v236_v36 }
 0x1af   :  { %244 = vadd.xlane.f32.xlu0 %v243_v37 }
 0x1b0   :  { %v246_v39 = vsel %vm125_vm0, %v242_v38, 0.0 }
 0x1b1   :  { %247 = vadd.xlane.f32.xlu1 %v246_v39 }
 0x222   :  { %v245_v40 = vpop.xlane.xlu0 %244 }
 0x223   :  { %v251_v41 = vadd.f32 %v250_v15, %v245_v40 }
 0x224   :  { %v248_v42 = vpop.xlane.xlu1 %247 }
 0x225   :  { %v338_v43 = vmul.f32 -1.442695, %v251_v41  ;;  %v252_v44 = vadd.f32 %v250_v15, %v248_v42 }
 0x227   :  { %363 = vpow2.f32 %v338_v43  ;;  %v339_v45 = vmul.f32 -1.442695, %v252_v44 }
 0x229   :  { %365 = vpow2.f32 %v339_v45 }
 0x22d   :  { %v364_v46 = vpop.eup %363 }
 0x22e   :  { %v259_v47 = vadd.f32 1.0, %v364_v46 }
 0x22f   :  { %v366_v48 = vpop.eup %365 }
 0x230   :  { %367 = vrcp.f32 %v259_v47  ;;  %v260_v49 = vadd.f32 1.0, %v366_v48  ;;  %v272_v55 = vand.u32 2147483648, %v259_v47  ;;  %v270_v59 = vand.u32 2147483647, %v259_v47 }
 0x231   :  { %vm266_vm4 = vweird.f32 %v259_v47 }
 0x232   :  { %369 = vrcp.f32 %v260_v49  ;;  %v287_v60 = vand.u32 2147483648, %v260_v49  ;;  %v285_v63 = vand.u32 2147483647, %v260_v49  ;;  %v273_v0 = vor.u32 1.1754944e-38, %v272_v55 }
 0x233   :  { %vm271_vm7 = vcmp.eq.f32.partialorder %v270_v59, 8.507059e+37  ;;  %vm281_vm8 = vweird.f32 %v260_v49 }
 0x234   :  { %v288_v5 = vor.u32 1.1754944e-38, %v287_v60  ;;  %vm286_vm10 = vcmp.eq.f32.partialorder %v285_v63, 8.507059e+37 }
 0x236   :  { %v368_v50 = vpop.eup %367 }
 0x237   :  { %v262_v51 = vmul.f32 %v368_v50, %v259_v47  ;;  %vm267_vm3 = vweird.f32 %v368_v50 }
 0x238   :  { %v370_v52 = vpop.eup %369  ;;  %vm268_vm6 = vmor %vm266_vm4, %vm267_vm3 }
 0x239   :  { %v263_v53 = vsub.f32 1.0, %v262_v51  ;;  %v277_v54 = vmul.f32 %v370_v52, %v260_v49  ;;  %vm282_vm5 = vweird.f32 %v370_v52 }
 0x23a   :  { %vm283_vm9 = vmor %vm281_vm8, %vm282_vm5 }
 0x23b   :  { %v264_v57 = vmul.f32 %v368_v50, %v263_v53  ;;  %v278_v58 = vsub.f32 1.0, %v277_v54 }
 0x23d   :  { %v279_v61 = vmul.f32 %v370_v52, %v278_v58  ;;  %v265_v62 = vadd.f32 %v368_v50, %v264_v57 }
 0x23f   :  { %v269_v2 = vsel %vm268_vm6, %v368_v50, %v265_v62  ;;  %v280_v3 = vadd.f32 %v370_v52, %v279_v61 }
 0x240   :  { %v274_v4 = vsel %vm271_vm7, %v273_v0, %v269_v2 }
 0x241   :  { %v284_v6 = vsel %vm283_vm9, %v370_v52, %v280_v3  ;;  %v295_v11 = vperm.slane %v274_v4, %v294_v1 }
 0x242   :  { %v289_v7 = vsel %vm286_vm10, %v288_v5, %v284_v6 }
 0x243   :  { %v296_v12 = vperm.slane %v289_v7, %v294_v1 }
 0x245   :  { %v297_v13 = vsel %vm188_vm2, %v296_v12, %v295_v11 }
 0x246   :  { %300 = vst.msk [vmem:[#allocation5] sm:$0x3] %vm299_vm11, %v297_v13 }
 0x247   :  { %324 = dma.vmem_to_hbm [thread:$0]  %s320_s12, 32, %s322_s24, [#allocation6]  }
 0x248   :  { %419 = dma.done.wait [#allocation4], 128  }
 0x249   :  { %420 = vsyncadd [#allocation4], 4294967168 }
 0x24a   :  { %421 = dma.done.wait [#allocation6], 32  }
 0x24b   :  { %422 = vsyncadd [#allocation6], 4294967264 }
 0x24c   :  { %333 = vsyncpa [#allocation4], 1 }
 0x24d   :  { %334 = vsyncpa [#allocation6], 1 }

</bundles_post_ra>
